<compile_context>
chip_gen: v6e
topology: v6e:2x2x1
jax: 0.10.0
libtpu: 0.0.40
codegen_flags: <defaults>
</compile_context>

<pallas_src>
import jax
import jax.numpy as jnp
from jax import lax
from jax.experimental import pallas as pl
from jax.experimental.pallas import tpu as pltpu


def _conv1x1_kernel(x_ref, w_ref, o_ref):
    # x_ref: [M, K]     (rows = N*H*W spatial positions, K = C_in), bf16
    # w_ref: [Cout, K]  (untransposed, squeezed OIHW weight),        bf16
    # o_ref: [M, Cout]  f32
    o_ref[...] = lax.dot_general(
        x_ref[...],
        w_ref[...],
        dimension_numbers=(((1,), (1,)), ((), ())),  # contract K with K
        preferred_element_type=jnp.float32,          # f32 accumulation on MXU
    )


def conv2d_1x1(x_nchw, weight_oihw, *, compute_dtype=jnp.bfloat16):
    """1x1 conv, stride 1, no bias.

    x_nchw:      [N, Cin, H, W]
    weight_oihw: [Cout, Cin, 1, 1] (any float dtype; bf16 recommended,
                 pre-cast once at parameter-load time).
    Returns f32 (x dtype) NCHW output [N, Cout, H, W].
    """
    N, Cin, H, W = x_nchw.shape
    Cout = weight_oihw.shape[0]

    # NCHW -> [N*H*W, Cin]; for H=W=1 this is a pure reshape (no data movement).
    x_rows = jnp.transpose(x_nchw, (0, 2, 3, 1)).reshape(N * H * W, Cin)
    x_rows = x_rows.astype(compute_dtype)            # tiny (N*H*W x Cin)

    # Keep weight untransposed: [Cout, Cin]. Cast is a no-op if already bf16.
    w_mat = weight_oihw.reshape(Cout, Cin).astype(compute_dtype)

    out_rows = pl.pallas_call(
        _conv1x1_kernel,
        out_shape=jax.ShapeDtypeStruct((N * H * W, Cout), jnp.float32),
        in_specs=[
            pl.BlockSpec(memory_space=pltpu.MemorySpace.VMEM),
            pl.BlockSpec(memory_space=pltpu.MemorySpace.VMEM),
        ],
        out_specs=pl.BlockSpec(memory_space=pltpu.MemorySpace.VMEM),
    )(x_rows, w_mat)

    out_rows = out_rows.astype(x_nchw.dtype)
    # [N*H*W, Cout] -> NCHW
    return jnp.transpose(out_rows.reshape(N, H, W, Cout), (0, 3, 1, 2))


if __name__ == "__main__":
    key = jax.random.PRNGKey(0)
    k_x, k_w = jax.random.split(key)

    # Shapes implied by the module: input [1, 960, 1, 1], weight [256, 960, 1, 1].
    x198 = jax.random.normal(k_x, (1, 960, 1, 1), dtype=jnp.float32)
    # Deterministic synthetic weight (PyTorch kaiming-ish scale ~ 1/sqrt(fan_in)).
    weight_f32 = jax.random.normal(k_w, (256, 960, 1, 1), dtype=jnp.float32) * (960 ** -0.5)

    # One-time, load-time cast of the static inference weight to bf16.
    weight = weight_f32.astype(jnp.bfloat16)

    out = conv2d_1x1(x198, weight)
    out = jax.block_until_ready(out)

    # Sanity: shape + same-precision (bf16 inputs, f32 accumulate) JAX reference.
    assert out.shape == (1, 256, 1, 1), out.shape
    ref = jnp.einsum(
        "nchw,oc->nohw",
        x198.astype(jnp.bfloat16).astype(jnp.float32),
        weight.reshape(256, 960).astype(jnp.float32),
    )
    assert jnp.allclose(out, ref, atol=1e-3, rtol=1e-3)

    print("KERNEL_OK")
</pallas_src>

<mosaic_0001>
module attributes {stable_mosaic.version = 11 : i64} {
  func.func @_conv1x1_kernel(%arg0: memref<1x960xbf16, #tpu.memory_space<vmem>>, %arg1: memref<256x960xbf16, #tpu.memory_space<vmem>>, %arg2: memref<1x256xf32, #tpu.memory_space<vmem>>) attributes {dimension_semantics = [], scalar_prefetch = 0 : i64, scratch_operands = 0 : i64, tpu.core_type = #tpu.core_type<tc>} {
    %c0 = arith.constant 0 : index
    %c0_0 = arith.constant 0 : index
    %0 = vector.load %arg0[%c0, %c0_0] : memref<1x960xbf16, #tpu.memory_space<vmem>>, vector<1x960xbf16>
    %c0_1 = arith.constant 0 : index
    %c0_2 = arith.constant 0 : index
    %1 = vector.load %arg1[%c0_1, %c0_2] : memref<256x960xbf16, #tpu.memory_space<vmem>>, vector<256x960xbf16>
    %cst = arith.constant dense<0.000000e+00> : vector<1x256xf32>
    %2 = tpu.matmul %0, %1, %cst {dimension_numbers = #tpu.dot_dimension_numbers<[1], [1], [0], [0], [0, 0, 1, 0], [], []>} : vector<1x960xbf16>, vector<256x960xbf16>, vector<1x256xf32> -> vector<1x256xf32>
    %c0_3 = arith.constant 0 : index
    %c0_4 = arith.constant 0 : index
    %3 = vector.load %arg2[%c0_3, %c0_4] : memref<1x256xf32, #tpu.memory_space<vmem>>, vector<1x256xf32>
    tpu.vector_store %arg2[%c0_3, %c0_4], %2 {strides = array<i32>} : memref<1x256xf32, #tpu.memory_space<vmem>>, vector<1x256xf32>,
    return
  }
}

</mosaic_0001>

<bundles_post_ra>
// kernel: tpu_custom_call.1
= control target key start
LH: loop header
LB: loop body
LE: loop exit
PB: predicated region body
PF: predicated region fallthrough
CT: control target
= control target key end

     0   :  { %v1245_v22 = vmov 1966171168   ;;  %v146_v24 = vlaneseq  ;;  %s1696_s0 = inlined_call_operand.vmem [shape: bf16[1,960], index: 0, kind: input, shape index: {}]   ;;  %s1697_s1 = inlined_call_operand.vmem [shape: bf16[256,960], index: 1, kind: input, shape index: {}]   ;;  %s1698_s2 = inlined_call_operand.hbm [shape: f32[1,256], index: 2, kind: output, shape index: {}]  }
   0x1   :  { %v69_v0 = vld [vmem:[%s1697_s1 + $0x1c0] sm:$0xff]  ;;  %v70_v2 = vld [vmem:[%s1697_s1 + $0x1c8] sm:$0xff]  ;;  %v144_v23 = vunpack.c.l.s4 %v1245_v22 }
   0x2   :  { %v73_v1 = vld [vmem:[%s1697_s1 + $0x1e0] sm:$0xff]  ;;  %v74_v4 = vld [vmem:[%s1697_s1 + $0x1e8] sm:$0xff]  ;;  %v147_v28 = vshrl.u32 %v146_v24, 7 }
   0x3   :  { %v1132_v3 = vcombine.high %v69_v0, %v73_v1  ;;  %v1131_v5 = vcombine.low %v69_v0, %v73_v1  ;;  %v61_v6 = vld [vmem:[%s1697_s1 + $0x180] sm:$0xff]  ;;  %v1134_v8 = vcombine.high %v70_v2, %v74_v4  ;;  %v1133_v9 = vcombine.low %v70_v2, %v74_v4  ;;  %v62_v11 = vld [vmem:[%s1697_s1 + $0x188] sm:$0xff] }
   0x4   :  { %v65_v7 = vld [vmem:[%s1697_s1 + $0x1a0] sm:$0xff]  ;;  %v66_v12 = vld [vmem:[%s1697_s1 + $0x1a8] sm:$0xff]  ;;  %v145_v27 = vunpack.c.0.s8 %v144_v23 }
   0x5   :  { %v1124_v10 = vcombine.high %v61_v6, %v65_v7  ;;  %874 = vmatprep.subr.bf16.mxu0 %v1132_v3  ;;  %v1126_v13 = vcombine.high %v62_v11, %v66_v12  ;;  %915 = vmatprep.subr.bf16.mxu1 %v1134_v8  ;;  %v53_v14 = vld [vmem:[%s1697_s1 + $0x140] sm:$0xff]  ;;  %v54_v16 = vld [vmem:[%s1697_s1 + $0x148] sm:$0xff]  ;;  %v1123_v18 = vcombine.low %v61_v6, %v65_v7 }
   0x6   :  { %875 = vmatpush1.bf16.xpose.msra.mxu0 %v1131_v5  ;;  %916 = vmatpush1.bf16.xpose.msra.mxu1 %v1133_v9  ;;  %v57_v15 = vld [vmem:[%s1697_s1 + $0x160] sm:$0xff]  ;;  %v58_v17 = vld [vmem:[%s1697_s1 + $0x168] sm:$0xff]  ;;  %v1125_v19 = vcombine.low %v62_v11, %v66_v12  ;;  %v1311_v35 = vsub.s32 %v145_v27, %v147_v28 }
   0x7   :  { %876 = vmatprep.subr.bf16.mxu0 %v1124_v10  ;;  %917 = vmatprep.subr.bf16.mxu1 %v1126_v13  ;;  %v1116_v20 = vcombine.high %v53_v14, %v57_v15  ;;  %v1118_v21 = vcombine.high %v54_v16, %v58_v17  ;;  %v45_v25 = vld [vmem:[%s1697_s1 + $0x100] sm:$0xff]  ;;  %v46_v29 = vld [vmem:[%s1697_s1 + $0x108] sm:$0xff]  ;;  %v1115_v31 = vcombine.low %v53_v14, %v57_v15 }
   0x8   :  { %v49_v26 = vld [vmem:[%s1697_s1 + $0x120] sm:$0xff]  ;;  %v50_v30 = vld [vmem:[%s1697_s1 + $0x128] sm:$0xff]  ;;  %v1117_v32 = vcombine.low %v54_v16, %v58_v17 }
   0x9   :  { %v1108_v33 = vcombine.high %v45_v25, %v49_v26  ;;  %v1110_v34 = vcombine.high %v46_v29, %v50_v30  ;;  %v1316_v36 = vld [vmem:[%s1696_s0] sm:$0xff]  ;;  %v38_v40 = vld [vmem:[%s1697_s1 + $0xc8] sm:$0xff]  ;;  %v1107_v42 = vcombine.low %v45_v25, %v49_v26  ;;  %v1109_v44 = vcombine.low %v46_v29, %v50_v30 }
   0xa   :  { %v37_v37 = vld [vmem:[%s1697_s1 + $0xc0] sm:$0xff]  ;;  %v1326_v39 = vrot.slane %v1316_v36, %v1311_v35  ;;  %v42_v41 = vld [vmem:[%s1697_s1 + $0xe8] sm:$0xff] }
   0xb   :  { %v41_v38 = vld [vmem:[%s1697_s1 + $0xe0] sm:$0xff]  ;;  %v1102_v46 = vcombine.high %v38_v40, %v42_v41 }
   0xc   :  { %v157_v43 = vcombine.high %v1326_v39, %v1326_v39  ;;  %v1100_v45 = vcombine.high %v37_v37, %v41_v38 }
   0xe   :  { %877 = vmatpush1.bf16.xpose.msra.mxu0 %v1123_v18  ;;  %918 = vmatpush1.bf16.xpose.msra.mxu1 %v1125_v19  ;;  %v179_v47 = vrot.slane %v157_v43, %v1311_v35 }
   0xf   :  { %878 = vmatprep.subr.bf16.mxu0 %v1116_v20  ;;  %919 = vmatprep.subr.bf16.mxu1 %v1118_v21 }
  0x16   :  { %879 = vmatpush1.bf16.xpose.msra.mxu0 %v1115_v31  ;;  %920 = vmatpush1.bf16.xpose.msra.mxu1 %v1117_v32 }
  0x17   :  { %880 = vmatprep.subr.bf16.mxu0 %v1108_v33  ;;  %921 = vmatprep.subr.bf16.mxu1 %v1110_v34 }
  0x18   :  { %7 = vsyncpa [#allocation3], 0  ;;  %906 = vmatprep.mubr.bf16.mxu0 %v179_v47  ;;  %v189_v48 = vcombine.high %v179_v47, %v179_v47  ;;  %v29_v49 = vld [vmem:[%s1697_s1 + $0x80] sm:$0xff]  ;;  %v30_v51 = vld [vmem:[%s1697_s1 + $0x88] sm:$0xff]  ;;  %v1099_v53 = vcombine.low %v37_v37, %v41_v38  ;;  %v1101_v54 = vcombine.low %v38_v40, %v42_v41  ;;  %vm822_vm0 = vcmask 523264  }
  0x19   :  { %v33_v50 = vld [vmem:[%s1697_s1 + $0xa0] sm:$0xff]  ;;  %v34_v52 = vld [vmem:[%s1697_s1 + $0xa8] sm:$0xff]  ;;  %vm1058_vm1 = vcmp.lt.s32.totalorder %v146_v24, 256 }
  0x1a   :  { %947 = vmatprep.mubr.bf16.mxu1 %v189_v48  ;;  %v1092_v55 = vcombine.high %v29_v49, %v33_v50  ;;  %v1094_v56 = vcombine.high %v30_v51, %v34_v52  ;;  %v21_v57 = vld [vmem:[%s1697_s1 + $0x40] sm:$0xff]  ;;  %v22_v59 = vld [vmem:[%s1697_s1 + $0x48] sm:$0xff]  ;;  %v1091_v61 = vcombine.low %v29_v49, %v33_v50  ;;  %v1093_v62 = vcombine.low %v30_v51, %v34_v52 }
  0x1b   :  { %v25_v58 = vld [vmem:[%s1697_s1 + $0x60] sm:$0xff]  ;;  %v26_v60 = vld [vmem:[%s1697_s1 + $0x68] sm:$0xff] }
  0x1c   :  { %v1084_v63 = vcombine.high %v21_v57, %v25_v58  ;;  %v1086_v0 = vcombine.high %v22_v59, %v26_v60  ;;  %v13_v1 = vld [vmem:[%s1697_s1] sm:$0xff]  ;;  %v14_v3 = vld [vmem:[%s1697_s1 + $0x8] sm:$0xff]  ;;  %v1083_v5 = vcombine.low %v21_v57, %v25_v58  ;;  %v1085_v6 = vcombine.low %v22_v59, %v26_v60 }
  0x1d   :  { %v17_v2 = vld [vmem:[%s1697_s1 + $0x20] sm:$0xff]  ;;  %v18_v4 = vld [vmem:[%s1697_s1 + $0x28] sm:$0xff] }
  0x1e   :  { %881 = vmatpush1.bf16.xpose.msra.mxu0 %v1107_v42  ;;  %922 = vmatpush1.bf16.xpose.msra.mxu1 %v1109_v44  ;;  %v1076_v7 = vcombine.high %v13_v1, %v17_v2  ;;  %v1078_v8 = vcombine.high %v14_v3, %v18_v4  ;;  %v133_v9 = vld [vmem:[%s1697_s1 + $0x3c0] sm:$0xff]  ;;  %v134_v11 = vld [vmem:[%s1697_s1 + $0x3c8] sm:$0xff]  ;;  %v1075_v13 = vcombine.low %v13_v1, %v17_v2 }
  0x1f   :  { %882 = vmatprep.subr.bf16.mxu0 %v1100_v45  ;;  %923 = vmatprep.subr.bf16.mxu1 %v1102_v46  ;;  %v137_v10 = vld [vmem:[%s1697_s1 + $0x3e0] sm:$0xff]  ;;  %v138_v12 = vld [vmem:[%s1697_s1 + $0x3e8] sm:$0xff]  ;;  %v1077_v14 = vcombine.low %v14_v3, %v18_v4 }
  0x20   :  { %v1196_v15 = vcombine.high %v133_v9, %v137_v10  ;;  %v1198_v16 = vcombine.high %v134_v11, %v138_v12  ;;  %v125_v17 = vld [vmem:[%s1697_s1 + $0x380] sm:$0xff]  ;;  %v126_v19 = vld [vmem:[%s1697_s1 + $0x388] sm:$0xff]  ;;  %v1195_v21 = vcombine.low %v133_v9, %v137_v10  ;;  %v1197_v22 = vcombine.low %v134_v11, %v138_v12 }
  0x21   :  { %v129_v18 = vld [vmem:[%s1697_s1 + $0x3a0] sm:$0xff]  ;;  %v130_v20 = vld [vmem:[%s1697_s1 + $0x3a8] sm:$0xff] }
  0x22   :  { %v1188_v23 = vcombine.high %v125_v17, %v129_v18  ;;  %v1190_v25 = vcombine.high %v126_v19, %v130_v20  ;;  %v117_v26 = vld [vmem:[%s1697_s1 + $0x340] sm:$0xff]  ;;  %v118_v28 = vld [vmem:[%s1697_s1 + $0x348] sm:$0xff]  ;;  %v1187_v30 = vcombine.low %v125_v17, %v129_v18  ;;  %v1189_v31 = vcombine.low %v126_v19, %v130_v20  ;;  %v76_v17 = vld [vmem:[%s1697_s1 + $0x1f8] sm:$0xff] }
  0x23   :  { %v121_v27 = vld [vmem:[%s1697_s1 + $0x360] sm:$0xff]  ;;  %v122_v29 = vld [vmem:[%s1697_s1 + $0x368] sm:$0xff] }
  0x24   :  { %v1180_v32 = vcombine.high %v117_v26, %v121_v27  ;;  %v1182_v33 = vcombine.high %v118_v28, %v122_v29  ;;  %v109_v34 = vld [vmem:[%s1697_s1 + $0x300] sm:$0xff]  ;;  %v110_v38 = vld [vmem:[%s1697_s1 + $0x308] sm:$0xff]  ;;  %v1179_v41 = vcombine.low %v117_v26, %v121_v27  ;;  %v1181_v42 = vcombine.low %v118_v28, %v122_v29  ;;  %v67_v26 = vld [vmem:[%s1697_s1 + $0x1b0] sm:$0xff] }
  0x25   :  { %v113_v37 = vld [vmem:[%s1697_s1 + $0x320] sm:$0xff]  ;;  %v114_v40 = vld [vmem:[%s1697_s1 + $0x328] sm:$0xff]  ;;  %v64_v27 = vld [vmem:[%s1697_s1 + $0x198] sm:$0xff] }
  0x26   :  { %883 = vmatpush1.bf16.xpose.msra.mxu0 %v1099_v53  ;;  %924 = vmatpush1.bf16.xpose.msra.mxu1 %v1101_v54  ;;  %v1172_v43 = vcombine.high %v109_v34, %v113_v37  ;;  %v1174_v44 = vcombine.high %v110_v38, %v114_v40  ;;  %v101_v45 = vld [vmem:[%s1697_s1 + $0x2c0] sm:$0xff]  ;;  %v102_v47 = vld [vmem:[%s1697_s1 + $0x2c8] sm:$0xff]  ;;  %v1171_v49 = vcombine.low %v109_v34, %v113_v37  ;;  %v55_v37 = vld [vmem:[%s1697_s1 + $0x150] sm:$0xff] }
  0x27   :  { %884 = vmatprep.subr.bf16.mxu0 %v1092_v55  ;;  %925 = vmatprep.subr.bf16.mxu1 %v1094_v56  ;;  %v105_v46 = vld [vmem:[%s1697_s1 + $0x2e0] sm:$0xff]  ;;  %v106_v48 = vld [vmem:[%s1697_s1 + $0x2e8] sm:$0xff]  ;;  %v1173_v50 = vcombine.low %v110_v38, %v114_v40  ;;  %v59_v38 = vld [vmem:[%s1697_s1 + $0x170] sm:$0xff] }
  0x28   :  { %v1164_v51 = vcombine.high %v101_v45, %v105_v46  ;;  %v1166_v52 = vcombine.high %v102_v47, %v106_v48  ;;  %v93_v53 = vld [vmem:[%s1697_s1 + $0x280] sm:$0xff]  ;;  %v94_v55 = vld [vmem:[%s1697_s1 + $0x288] sm:$0xff]  ;;  %v1163_v57 = vcombine.low %v101_v45, %v105_v46  ;;  %v1165_v58 = vcombine.low %v102_v47, %v106_v48  ;;  %v56_v40 = vld [vmem:[%s1697_s1 + $0x158] sm:$0xff] }
  0x29   :  { %v97_v54 = vld [vmem:[%s1697_s1 + $0x2a0] sm:$0xff]  ;;  %v98_v56 = vld [vmem:[%s1697_s1 + $0x2a8] sm:$0xff]  ;;  %v47_v46 = vld [vmem:[%s1697_s1 + $0x110] sm:$0xff] }
  0x2a   :  { %v1156_v59 = vcombine.high %v93_v53, %v97_v54  ;;  %v1158_v60 = vcombine.high %v94_v55, %v98_v56  ;;  %v1155_v1 = vcombine.low %v93_v53, %v97_v54  ;;  %v1157_v2 = vcombine.low %v94_v55, %v98_v56  ;;  %v51_v47 = vld [vmem:[%s1697_s1 + $0x130] sm:$0xff]  ;;  %v48_v48 = vld [vmem:[%s1697_s1 + $0x118] sm:$0xff] }
  0x2b   :  { %v39_v54 = vld [vmem:[%s1697_s1 + $0xd0] sm:$0xff]  ;;  %v40_v56 = vld [vmem:[%s1697_s1 + $0xd8] sm:$0xff] }
  0x2c   :  { %v43_v55 = vld [vmem:[%s1697_s1 + $0xf0] sm:$0xff] }
  0x2e   :  { %885 = vmatpush1.bf16.xpose.msra.mxu0 %v1091_v61  ;;  %926 = vmatpush1.bf16.xpose.msra.mxu1 %v1093_v62  ;;  %v85_v61 = vld [vmem:[%s1697_s1 + $0x240] sm:$0xff] }
  0x2f   :  { %886 = vmatprep.subr.bf16.mxu0 %v1084_v63  ;;  %927 = vmatprep.subr.bf16.mxu1 %v1086_v0  ;;  %v89_v62 = vld [vmem:[%s1697_s1 + $0x260] sm:$0xff]  ;;  %v86_v63 = vld [vmem:[%s1697_s1 + $0x248] sm:$0xff] }
  0x30   :  { %v90_v0 = vld [vmem:[%s1697_s1 + $0x268] sm:$0xff]  ;;  %v1148_v3 = vcombine.high %v85_v61, %v89_v62  ;;  %v1147_v9 = vcombine.low %v85_v61, %v89_v62  ;;  %v31_v62 = vld [vmem:[%s1697_s1 + $0x90] sm:$0xff] }
  0x31   :  { %v1150_v4 = vcombine.high %v86_v63, %v90_v0  ;;  %v1149_v10 = vcombine.low %v86_v63, %v90_v0  ;;  %v35_v63 = vld [vmem:[%s1697_s1 + $0xb0] sm:$0xff]  ;;  %v32_v0 = vld [vmem:[%s1697_s1 + $0x98] sm:$0xff] }
  0x36   :  { %887 = vmatpush1.bf16.xpose.msra.mxu0 %v1083_v5  ;;  %928 = vmatpush1.bf16.xpose.msra.mxu1 %v1085_v6  ;;  %v77_v5 = vld [vmem:[%s1697_s1 + $0x200] sm:$0xff] }
  0x37   :  { %888 = vmatprep.subr.bf16.mxu0 %v1076_v7  ;;  %929 = vmatprep.subr.bf16.mxu1 %v1078_v8  ;;  %v81_v6 = vld [vmem:[%s1697_s1 + $0x220] sm:$0xff]  ;;  %v78_v7 = vld [vmem:[%s1697_s1 + $0x208] sm:$0xff] }
  0x38   :  { %v82_v8 = vld [vmem:[%s1697_s1 + $0x228] sm:$0xff]  ;;  %v1140_v11 = vcombine.high %v77_v5, %v81_v6  ;;  %v1139_v18 = vcombine.low %v77_v5, %v81_v6  ;;  %v23_v6 = vld [vmem:[%s1697_s1 + $0x50] sm:$0xff] }
  0x39   :  { %v1142_v12 = vcombine.high %v78_v7, %v82_v8  ;;  %v1141_v19 = vcombine.low %v78_v7, %v82_v8  ;;  %v27_v7 = vld [vmem:[%s1697_s1 + $0x70] sm:$0xff]  ;;  %v24_v8 = vld [vmem:[%s1697_s1 + $0x58] sm:$0xff] }
  0x3e   :  { %889 = vmatpush1.bf16.xpose.msra.mxu0 %v1075_v13  ;;  %930 = vmatpush1.bf16.xpose.msra.mxu1 %v1077_v14  ;;  %v71_v13 = vld [vmem:[%s1697_s1 + $0x1d0] sm:$0xff] }
  0x3f   :  { %890 = vmatprep.subr.bf16.mxu0 %v1196_v15  ;;  %931 = vmatprep.subr.bf16.mxu1 %v1198_v16  ;;  %v75_v14 = vld [vmem:[%s1697_s1 + $0x1f0] sm:$0xff]  ;;  %v142_v15 = vcombine.high %v1316_v36, %v1316_v36  ;;  %v72_v16 = vld [vmem:[%s1697_s1 + $0x1d8] sm:$0xff]  ;;  %v165_v36 = vrot.slane %v1326_v39, %v1311_v35 }
  0x40   :  { %v1136_v20 = vcombine.high %v71_v13, %v75_v14  ;;  %v68_v39 = vld [vmem:[%s1697_s1 + $0x1b8] sm:$0xff] }
  0x41   :  { %v187_v29 = vcombine.high %v165_v36, %v165_v36 }
  0x46   :  { %891 = vmatpush2.bf16.xpose.msra.mxu0 %v1195_v21  ;;  %932 = vmatpush2.bf16.xpose.msra.mxu1 %v1197_v22  ;;  %v1138_v21 = vcombine.high %v72_v16, %v76_v17  ;;  %v1484_v22 = vrot.slane %v142_v15, %v1311_v35  ;;  %v19_v15 = vld [vmem:[%s1697_s1 + $0x30] sm:$0xff] }
  0x47   :  { %892 = vmatprep.subr.bf16.mxu0 %v1188_v23  ;;  %933 = vmatprep.subr.bf16.mxu1 %v1190_v25  ;;  %v63_v25 = vld [vmem:[%s1697_s1 + $0x190] sm:$0xff] }
  0x48   :  { %v158_v23 = vcombine.high %v1484_v22, %v1484_v22 }
  0x4a   :  { %v186_v28 = vrot.slane %v158_v23, %v1311_v35  ;;  %v139_v23 = vld [vmem:[%s1697_s1 + $0x3f0] sm:$0xff] }
  0x4c   :  { %v190_v34 = vcombine.high %v186_v28, %v186_v28 }
  0x4e   :  { %893 = vmatpush2.bf16.xpose.msra.mxu0 %v1187_v30  ;;  %934 = vmatpush2.bf16.xpose.msra.mxu1 %v1189_v31  ;;  %v1135_v30 = vcombine.low %v71_v13, %v75_v14  ;;  %v1137_v31 = vcombine.low %v72_v16, %v76_v17  ;;  %v15_v14 = vld [vmem:[%s1697_s1 + $0x10] sm:$0xff]  ;;  %v16_v16 = vld [vmem:[%s1697_s1 + $0x18] sm:$0xff] }
  0x4f   :  { %894 = vmatprep.subr.bf16.mxu0 %v1180_v32  ;;  %935 = vmatprep.subr.bf16.mxu1 %v1182_v33  ;;  %v1128_v32 = vcombine.high %v63_v25, %v67_v26  ;;  %v1130_v33 = vcombine.high %v64_v27, %v68_v39  ;;  %v20_v17 = vld [vmem:[%s1697_s1 + $0x38] sm:$0xff] }
  0x56   :  { %895 = vmatpush2.bf16.xpose.msra.mxu0 %v1179_v41  ;;  %936 = vmatpush2.bf16.xpose.msra.mxu1 %v1181_v42  ;;  %v60_v41 = vld [vmem:[%s1697_s1 + $0x178] sm:$0xff]  ;;  %v1127_v42 = vcombine.low %v63_v25, %v67_v26 }
  0x57   :  { %896 = vmatprep.subr.bf16.mxu0 %v1172_v43  ;;  %937 = vmatprep.subr.bf16.mxu1 %v1174_v44  ;;  %v1129_v43 = vcombine.low %v64_v27, %v68_v39  ;;  %v1120_v44 = vcombine.high %v55_v37, %v59_v38  ;;  %v1122_v45 = vcombine.high %v56_v40, %v60_v41  ;;  %v136_v25 = vld [vmem:[%s1697_s1 + $0x3d8] sm:$0xff] }
  0x58   :  { %v140_v26 = vld [vmem:[%s1697_s1 + $0x3f8] sm:$0xff]  ;;  %v1079_v27 = vcombine.low %v15_v14, %v19_v15  ;;  %v1081_v39 = vcombine.low %v16_v16, %v20_v17 }
  0x5e   :  { %897 = vmatpush2.bf16.xpose.msra.mxu0 %v1171_v49  ;;  %938 = vmatpush2.bf16.xpose.msra.mxu1 %v1173_v50  ;;  %v52_v49 = vld [vmem:[%s1697_s1 + $0x138] sm:$0xff]  ;;  %v1119_v50 = vcombine.low %v55_v37, %v59_v38  ;;  %v1201_v37 = vcombine.low %v136_v25, %v140_v26 }
  0x5f   :  { %898 = vmatprep.subr.bf16.mxu0 %v1164_v51  ;;  %939 = vmatprep.subr.bf16.mxu1 %v1166_v52  ;;  %v1121_v51 = vcombine.low %v56_v40, %v60_v41  ;;  %v1112_v52 = vcombine.high %v47_v46, %v51_v47  ;;  %v1114_v53 = vcombine.high %v48_v48, %v52_v49  ;;  %v119_v41 = vld [vmem:[%s1697_s1 + $0x350] sm:$0xff] }
  0x66   :  { %899 = vmatpush2.bf16.xpose.msra.mxu0 %v1163_v57  ;;  %940 = vmatpush2.bf16.xpose.msra.mxu1 %v1165_v58  ;;  %v44_v57 = vld [vmem:[%s1697_s1 + $0xf8] sm:$0xff]  ;;  %v1111_v58 = vcombine.low %v47_v46, %v51_v47 }
  0x67   :  { %900 = vmatprep.subr.bf16.mxu0 %v1156_v59  ;;  %941 = vmatprep.subr.bf16.mxu1 %v1158_v60  ;;  %v1113_v59 = vcombine.low %v48_v48, %v52_v49  ;;  %v1104_v60 = vcombine.high %v39_v54, %v43_v55  ;;  %v1106_v61 = vcombine.high %v40_v56, %v44_v57  ;;  %v111_v49 = vld [vmem:[%s1697_s1 + $0x310] sm:$0xff] }
  0x6e   :  { %901 = vmatpush2.bf16.xpose.msra.mxu0 %v1155_v1  ;;  %942 = vmatpush2.bf16.xpose.msra.mxu1 %v1157_v2  ;;  %v36_v1 = vld [vmem:[%s1697_s1 + $0xb8] sm:$0xff]  ;;  %v1103_v2 = vcombine.low %v39_v54, %v43_v55 }
  0x6f   :  { %902 = vmatprep.subr.bf16.mxu0 %v1148_v3  ;;  %943 = vmatprep.subr.bf16.mxu1 %v1150_v4  ;;  %v1105_v3 = vcombine.low %v40_v56, %v44_v57  ;;  %v1096_v4 = vcombine.high %v31_v62, %v35_v63  ;;  %v1098_v5 = vcombine.high %v32_v0, %v36_v1  ;;  %v103_v57 = vld [vmem:[%s1697_s1 + $0x2d0] sm:$0xff] }
  0x76   :  { %903 = vmatpush2.bf16.xpose.msra.mxu0 %v1147_v9  ;;  %944 = vmatpush2.bf16.xpose.msra.mxu1 %v1149_v10  ;;  %v28_v9 = vld [vmem:[%s1697_s1 + $0x78] sm:$0xff]  ;;  %v1095_v10 = vcombine.low %v31_v62, %v35_v63 }
  0x77   :  { %904 = vmatprep.subr.bf16.mxu0 %v1140_v11  ;;  %945 = vmatprep.subr.bf16.mxu1 %v1142_v12  ;;  %v1097_v11 = vcombine.low %v32_v0, %v36_v1  ;;  %v1088_v12 = vcombine.high %v23_v6, %v27_v7  ;;  %v1090_v13 = vcombine.high %v24_v8, %v28_v9  ;;  %v95_v1 = vld [vmem:[%s1697_s1 + $0x290] sm:$0xff] }
  0x7e   :  { %905 = vmatpush2.bf16.xpose.msra.mxu0 %v1139_v18  ;;  %946 = vmatpush2.bf16.xpose.msra.mxu1 %v1141_v19  ;;  %v1087_v18 = vcombine.low %v23_v6, %v27_v7  ;;  %v1089_v19 = vcombine.low %v24_v8, %v28_v9  ;;  %v87_v9 = vld [vmem:[%s1697_s1 + $0x250] sm:$0xff] }
  0x7f   :  { %956 = vmatprep.subr.bf16.mxu0 %v1136_v20  ;;  %1203 = vmatprep.subr.msk.bf16.mxu1 %vm822_vm0, %v1138_v21  ;;  %v1080_v20 = vcombine.high %v15_v14, %v19_v15  ;;  %v1082_v21 = vcombine.high %v16_v16, %v20_v17  ;;  %v79_v17 = vld [vmem:[%s1697_s1 + $0x210] sm:$0xff] }
  0x85   :  { %907 = vmatmul.mubr.bf16.vlgmr.msra.gmra.mxu0 %v165_v36  ;;  %948 = vmatmul.mubr.bf16.vlgmr.msra.gmra.mxu1 %v187_v29  ;;  %v135_v36 = vld [vmem:[%s1697_s1 + $0x3d0] sm:$0xff]  ;;  %v1202_v29 = vcombine.high %v136_v25, %v140_v26 }
  0x86   :  { %957 = vmatpush1.bf16.xpose.msra.mxu0 %v1135_v30  ;;  %998 = vmatpush1.bf16.xpose.msra.mxu1 %v1137_v31  ;;  %v127_v30 = vld [vmem:[%s1697_s1 + $0x390] sm:$0xff] }
  0x87   :  { %958 = vmatprep.subr.bf16.mxu0 %v1128_v32  ;;  %1204 = vmatprep.subr.msk.bf16.mxu1 %vm822_vm0, %v1130_v33  ;;  %v131_v31 = vld [vmem:[%s1697_s1 + $0x3b0] sm:$0xff]  ;;  %v128_v32 = vld [vmem:[%s1697_s1 + $0x398] sm:$0xff] }
  0x88   :  { %988 = vmatprep.mubr.bf16.mxu0 %v186_v28  ;;  %1219 = vmatprep.mubr.msk.bf16.mxu1 %vm822_vm0, %v190_v34  ;;  %v1200_v28 = vcombine.high %v135_v36, %v139_v23  ;;  %v132_v33 = vld [vmem:[%s1697_s1 + $0x3b8] sm:$0xff]  ;;  %v1199_v34 = vcombine.low %v135_v36, %v139_v23  ;;  %v1192_v38 = vcombine.high %v127_v30, %v131_v31 }
  0x89   :  { %v1194_v40 = vcombine.high %v128_v32, %v132_v33  ;;  %v1193_v46 = vcombine.low %v128_v32, %v132_v33 }
  0x8e   :  { %959 = vmatpush1.bf16.xpose.msra.mxu0 %v1127_v42  ;;  %1000 = vmatpush1.bf16.xpose.msra.mxu1 %v1129_v43  ;;  %v123_v42 = vld [vmem:[%s1697_s1 + $0x370] sm:$0xff]  ;;  %v120_v43 = vld [vmem:[%s1697_s1 + $0x358] sm:$0xff] }
  0x8f   :  { %960 = vmatprep.subr.bf16.mxu0 %v1120_v44  ;;  %1205 = vmatprep.subr.msk.bf16.mxu1 %vm822_vm0, %v1122_v45  ;;  %v124_v44 = vld [vmem:[%s1697_s1 + $0x378] sm:$0xff]  ;;  %v1191_v45 = vcombine.low %v127_v30, %v131_v31  ;;  %v1184_v47 = vcombine.high %v119_v41, %v123_v42 }
  0x90   :  { %v1186_v48 = vcombine.high %v120_v43, %v124_v44  ;;  %v1185_v54 = vcombine.low %v120_v43, %v124_v44 }
  0x96   :  { %961 = vmatpush1.bf16.xpose.msra.mxu0 %v1119_v50  ;;  %1002 = vmatpush1.bf16.xpose.msra.mxu1 %v1121_v51  ;;  %v115_v50 = vld [vmem:[%s1697_s1 + $0x330] sm:$0xff]  ;;  %v112_v51 = vld [vmem:[%s1697_s1 + $0x318] sm:$0xff] }
  0x97   :  { %962 = vmatprep.subr.bf16.mxu0 %v1112_v52  ;;  %1206 = vmatprep.subr.msk.bf16.mxu1 %vm822_vm0, %v1114_v53  ;;  %v116_v52 = vld [vmem:[%s1697_s1 + $0x338] sm:$0xff]  ;;  %v1183_v53 = vcombine.low %v119_v41, %v123_v42  ;;  %v1176_v55 = vcombine.high %v111_v49, %v115_v50 }
  0x98   :  { %v1178_v56 = vcombine.high %v112_v51, %v116_v52  ;;  %v1177_v62 = vcombine.low %v112_v51, %v116_v52 }
  0x9e   :  { %963 = vmatpush1.bf16.xpose.msra.mxu0 %v1111_v58  ;;  %1004 = vmatpush1.bf16.xpose.msra.mxu1 %v1113_v59  ;;  %v107_v58 = vld [vmem:[%s1697_s1 + $0x2f0] sm:$0xff]  ;;  %v104_v59 = vld [vmem:[%s1697_s1 + $0x2d8] sm:$0xff] }
  0x9f   :  { %964 = vmatprep.subr.bf16.mxu0 %v1104_v60  ;;  %1207 = vmatprep.subr.msk.bf16.mxu1 %vm822_vm0, %v1106_v61  ;;  %v108_v60 = vld [vmem:[%s1697_s1 + $0x2f8] sm:$0xff]  ;;  %v1175_v61 = vcombine.low %v111_v49, %v115_v50  ;;  %v1168_v63 = vcombine.high %v103_v57, %v107_v58 }
  0xa0   :  { %v1170_v0 = vcombine.high %v104_v59, %v108_v60  ;;  %v1169_v6 = vcombine.low %v104_v59, %v108_v60 }
  0xa6   :  { %965 = vmatpush1.bf16.xpose.msra.mxu0 %v1103_v2  ;;  %1006 = vmatpush1.bf16.xpose.msra.mxu1 %v1105_v3  ;;  %v99_v2 = vld [vmem:[%s1697_s1 + $0x2b0] sm:$0xff]  ;;  %v96_v3 = vld [vmem:[%s1697_s1 + $0x298] sm:$0xff] }
  0xa7   :  { %966 = vmatprep.subr.bf16.mxu0 %v1096_v4  ;;  %1208 = vmatprep.subr.msk.bf16.mxu1 %vm822_vm0, %v1098_v5  ;;  %v100_v4 = vld [vmem:[%s1697_s1 + $0x2b8] sm:$0xff]  ;;  %v1167_v5 = vcombine.low %v103_v57, %v107_v58  ;;  %v1160_v7 = vcombine.high %v95_v1, %v99_v2 }
  0xa8   :  { %v1162_v8 = vcombine.high %v96_v3, %v100_v4  ;;  %v1161_v14 = vcombine.low %v96_v3, %v100_v4 }
  0xae   :  { %967 = vmatpush1.bf16.xpose.msra.mxu0 %v1095_v10  ;;  %1008 = vmatpush1.bf16.xpose.msra.mxu1 %v1097_v11  ;;  %v91_v10 = vld [vmem:[%s1697_s1 + $0x270] sm:$0xff]  ;;  %v88_v11 = vld [vmem:[%s1697_s1 + $0x258] sm:$0xff] }
  0xaf   :  { %968 = vmatprep.subr.bf16.mxu0 %v1088_v12  ;;  %1209 = vmatprep.subr.msk.bf16.mxu1 %vm822_vm0, %v1090_v13  ;;  %v92_v12 = vld [vmem:[%s1697_s1 + $0x278] sm:$0xff]  ;;  %v1159_v13 = vcombine.low %v95_v1, %v99_v2  ;;  %v1152_v15 = vcombine.high %v87_v9, %v91_v10 }
  0xb0   :  { %v1154_v16 = vcombine.high %v88_v11, %v92_v12  ;;  %v1153_v36 = vcombine.low %v88_v11, %v92_v12 }
  0xb6   :  { %969 = vmatpush1.bf16.xpose.msra.mxu0 %v1087_v18  ;;  %1010 = vmatpush1.bf16.xpose.msra.mxu1 %v1089_v19  ;;  %v83_v18 = vld [vmem:[%s1697_s1 + $0x230] sm:$0xff]  ;;  %v80_v19 = vld [vmem:[%s1697_s1 + $0x218] sm:$0xff] }
  0xb7   :  { %970 = vmatprep.subr.bf16.mxu0 %v1080_v20  ;;  %1210 = vmatprep.subr.msk.bf16.mxu1 %vm822_vm0, %v1082_v21  ;;  %v84_v20 = vld [vmem:[%s1697_s1 + $0x238] sm:$0xff]  ;;  %v1151_v21 = vcombine.low %v87_v9, %v91_v10  ;;  %v1144_v23 = vcombine.high %v79_v17, %v83_v18  ;;  %v1143_v26 = vcombine.low %v79_v17, %v83_v18  ;;  %s1246_s1 = smov [#allocation2]  }
  0xb8   :  { %v1146_v25 = vcombine.high %v80_v19, %v84_v20  ;;  %s1067_s7 = sshll.u32 %s1246_s1, 4  ;;  %s1068_s7 = int_to_ptr.vmem [resolvable:$true] %s1067_s7 }
  0xb9   :  { %s1223_s8 = scalar_lea.vmem %s1068_s7, 32  ;;  %p1228_p1 = scmp.lt.s32.totalorder %s1068_s7, %s1068_s7 }
  0xba   :  { %p1224_p0 = scmp.ne.s32.totalorder %s1068_s7, %s1223_s8  ;;  %p1229_p2 = scmp.lt.s32.totalorder %s1223_s8, %s1223_s8 }
  0xbc   :  { %p1230_p3 = por %p1229_p2, %p1228_p1 }
  0xbe   :  { %971 = vmatpush1.bf16.xpose.msra.mxu0 %v1079_v27  ;;  %1012 = vmatpush1.bf16.xpose.msra.mxu1 %v1081_v39  ;;  %v1145_v27 = vcombine.low %v80_v19, %v84_v20  ;;  %v172_v39 = vrot.slane %v1484_v22, %v1311_v35  ;;  %p1231_p4 = pnand %p1230_p3, %p1224_p0 }
  0xbf   :  { %972 = vmatprep.subr.bf16.mxu0 %v1200_v28  ;;  %1211 = vmatprep.subr.msk.bf16.mxu1 %vm822_vm0, %v1202_v29 }
  0xc0   :  { %v188_v28 = vcombine.high %v172_v39, %v172_v39 }
  0xc6   :  { %973 = vmatpush2.bf16.xpose.msra.mxu0 %v1199_v34  ;;  %1014 = vmatpush2.bf16.xpose.msra.mxu1 %v1201_v37 }
  0xc7   :  { %974 = vmatprep.subr.bf16.mxu0 %v1192_v38  ;;  %1212 = vmatprep.subr.msk.bf16.mxu1 %vm822_vm0, %v1194_v40 }
  0xce   :  { %975 = vmatpush2.bf16.xpose.msra.mxu0 %v1191_v45  ;;  %1016 = vmatpush2.bf16.xpose.msra.mxu1 %v1193_v46 }
  0xcf   :  { %976 = vmatprep.subr.bf16.mxu0 %v1184_v47  ;;  %1213 = vmatprep.subr.msk.bf16.mxu1 %vm822_vm0, %v1186_v48 }
  0xd6   :  { %977 = vmatpush2.bf16.xpose.msra.mxu0 %v1183_v53  ;;  %1018 = vmatpush2.bf16.xpose.msra.mxu1 %v1185_v54 }
  0xd7   :  { %978 = vmatprep.subr.bf16.mxu0 %v1176_v55  ;;  %1214 = vmatprep.subr.msk.bf16.mxu1 %vm822_vm0, %v1178_v56 }
  0xde   :  { %979 = vmatpush2.bf16.xpose.msra.mxu0 %v1175_v61  ;;  %1020 = vmatpush2.bf16.xpose.msra.mxu1 %v1177_v62 }
  0xdf   :  { %980 = vmatprep.subr.bf16.mxu0 %v1168_v63  ;;  %1215 = vmatprep.subr.msk.bf16.mxu1 %vm822_vm0, %v1170_v0 }
  0xe6   :  { %981 = vmatpush2.bf16.xpose.msra.mxu0 %v1167_v5  ;;  %1022 = vmatpush2.bf16.xpose.msra.mxu1 %v1169_v6 }
  0xe7   :  { %982 = vmatprep.subr.bf16.mxu0 %v1160_v7  ;;  %1216 = vmatprep.subr.msk.bf16.mxu1 %vm822_vm0, %v1162_v8 }
  0xee   :  { %983 = vmatpush2.bf16.xpose.msra.mxu0 %v1159_v13  ;;  %1024 = vmatpush2.bf16.xpose.msra.mxu1 %v1161_v14 }
  0xef   :  { %984 = vmatprep.subr.bf16.mxu0 %v1152_v15  ;;  %1217 = vmatprep.subr.msk.bf16.mxu1 %vm822_vm0, %v1154_v16 }
  0xf6   :  { %985 = vmatpush2.bf16.xpose.msra.mxu0 %v1151_v21  ;;  %1026 = vmatpush2.bf16.xpose.msra.mxu1 %v1153_v36 }
  0xf7   :  { %986 = vmatprep.subr.bf16.mxu0 %v1144_v23  ;;  %1218 = vmatprep.subr.msk.bf16.mxu1 %vm822_vm0, %v1146_v25 }
  0xfe   :  { %987 = vmatpush2.bf16.xpose.msra.mxu0 %v1143_v26  ;;  %1028 = vmatpush2.bf16.xpose.msra.mxu1 %v1145_v27 }
 0x105   :  { %989 = vmatmul.mubr.bf16.vlgmr.msra.gmra.mxu0 %v172_v39  ;;  %1030 = vmatmul.mubr.bf16.vlgmr.msra.gmra.mxu1 %v188_v28 }
 0x145   :  { %v908_v29 = vpop.f32.mrf.mxu0  ;;  %v949_v30 = vpop.f32.mrf.mxu1 }
 0x146   :  { %v950_v31 = vadd.f32 %v949_v30, %v908_v29 }
 0x147   :  { %v910_v32 = vpop.f32.mrf.mxu0  ;;  %v951_v33 = vpop.f32.mrf.mxu1 }
 0x148   :  { %v952_v34 = vadd.f32 %v951_v33, %v910_v32 }
 0x149   :  { %v912_v37 = vpop.f32.mrf.mxu0  ;;  %v953_v38 = vpop.f32.mrf.mxu1 }
 0x14b   :  { %v913_v40 = vpop.f32.mrf.mxu0  ;;  %v954_v41 = vpop.f32.mrf.mxu1 }
 0x1c5   :  { %v990_v42 = vpop.f32.mrf.mxu0  ;;  %v1031_v44 = vpop.f32.mrf.mxu1 }
 0x1c6   :  { %v991_v43 = vadd.f32 %v990_v42, %v950_v31 }
 0x1c7   :  { %v992_v45 = vpop.f32.mrf.mxu0  ;;  %v1033_v22 = vpop.f32.mrf.mxu1 }
 0x1c8   :  { %v993_v46 = vadd.f32 %v992_v45, %v952_v34  ;;  %v1032_v48 = vadd.f32 %v1031_v44, %v991_v43 }
 0x1c9   :  { %v994_v47 = vpop.f32.mrf.mxu0  ;;  %v1035_v50 = vpop.f32.mrf.mxu1 }
 0x1ca   :  { %v1034_v49 = vadd.f32 %v1033_v22, %v993_v46 }
 0x1cb   :  { %v995_v51 = vpop.f32.mrf.mxu0  ;;  %v1036_v53 = vpop.f32.mrf.mxu1 }
 0x1cc   :  { %v1040_v52 = vcombine.low %v1032_v48, %v1034_v49 }
 0x1ce   :  { %v1047_v54 = vrot.slane %v1040_v52, %v1311_v35 }
 0x1d0   :  { %v1054_v55 = vrot.slane %v1047_v54, %v1311_v35 }
 0x1d2   :  { %1060 = vst.msk [vmem:[#allocation2] sm:$0x3] %vm1058_vm1, %v1054_v55 }
 0x1d3   :  { %1234 = shalt.err (!%p1231_p4)
}
 0x1d4   :  { %1070 = dma.vmem_to_hbm [thread:$0]  %s1068_s7, 32, %s1698_s2, [#allocation3]  }
 0x1d5   :  { %1243 = dma.done.wait [#allocation3], 32  }
 0x1d6   :  { %1244 = vsyncadd [#allocation3], 4294967264 }
 0x1d7   :  { %1074 = vsyncpa [#allocation3], 1 }

</bundles_post_ra>
